<compile_context>
chip_gen: v6e
topology: v6e:2x2x1
jax: 0.10.0
libtpu: 0.0.40
codegen_flags: <defaults>
</compile_context>

<pallas_src>
import functools

import jax
import jax.numpy as jnp
from jax.experimental import pallas as pl
from jax.experimental.pallas import tpu as pltpu


def _round_up(x, m):
    return (x + m - 1) // m * m


def _vmem_capacity_bytes():
    try:
        return int(pltpu.get_tpu_info().vmem_capacity_bytes)
    except Exception:
        return 64 * 1024 * 1024  # v7x floor; safe on every generation


# ------------------------------------------------------------- fused path ---

def _ca_fused_kernel(x_ref, w1t_ref, b1_ref, w2t_ref, b2_ref, o_ref, *, inv_hw):
    x = x_ref[...]                                                # (B, C, HWp)
    xf = x.astype(jnp.float32)
    # AdaptiveAvgPool2d(1): zero lane-padding does not perturb the sum; divide
    # by the true H*W.
    mean = jnp.sum(xf, axis=-1) * inv_hw                          # (B, C)
    # Conv2d(C, Cr, 1) + bias, ReLU
    y1 = jnp.dot(mean, w1t_ref[...],
                 preferred_element_type=jnp.float32) + b1_ref[...]   # (B, Cr)
    y1 = jnp.maximum(y1, 0.0)
    # Conv2d(Cr, C, 1) + bias, Sigmoid
    y2 = jnp.dot(y1, w2t_ref[...],
                 preferred_element_type=jnp.float32) + b2_ref[...]   # (B, C)
    gate = jax.nn.sigmoid(y2)                                     # (B, C)
    # Broadcast the per-channel gate over all spatial positions.
    o_ref[...] = (xf * gate[:, :, None]).astype(o_ref.dtype)


# --------------------------------------------------------- two-phase path ---

def _pool_kernel(x_ref, sum_ref):
    @pl.when(pl.program_id(1) == 0)
    def _():
        sum_ref[...] = jnp.zeros_like(sum_ref)
    sum_ref[...] += jnp.sum(x_ref[...].astype(jnp.float32), axis=-1,
                            keepdims=True)                        # (1, C, 1)


def _scale_kernel(x_ref, g_ref, o_ref):
    # x: (1, C, T), g: (1, C, 1) f32
    o_ref[...] = (x_ref[...].astype(jnp.float32) * g_ref[...]).astype(o_ref.dtype)


# ---------------------------------------------------------------- wrapper ---

def ca_layer(x, w1, b1, w2, b2, *, vmem_budget_bytes=None, force_two_phase=False):
    """x: (N, C, H, W); w1: (Cr, C); b1: (Cr,); w2: (C, Cr); b2: (C,)."""
    N, C, H, W = x.shape
    HW = H * W
    Cr = w1.shape[0]
    dtype = x.dtype
    esize = jnp.dtype(dtype).itemsize

    vmem_cap = _vmem_capacity_bytes()
    if vmem_budget_bytes is None:
        vmem_budget_bytes = int(vmem_cap * 0.75)  # leave headroom

    # Pre-transpose the 1x1-conv weights so the in-kernel matmuls are plain
    # row-major (B, C)@(C, Cr) / (B, Cr)@(Cr, C); biases become (1, K) rows.
    w1_t = jnp.asarray(w1).T.astype(jnp.float32)        # (C, Cr)
    w2_t = jnp.asarray(w2).T.astype(jnp.float32)        # (Cr, C)
    b1_r = jnp.asarray(b1).reshape(1, Cr).astype(jnp.float32)
    b2_r = jnp.asarray(b2).reshape(1, C).astype(jnp.float32)
    w_bytes = 2 * 4 * (w1_t.size + w2_t.size + b1_r.size + b2_r.size)

    HW128 = _round_up(HW, 128)                          # lane-dense last dim

    def fused_footprint(b_blk):
        # x block + out block, each double-buffered, plus the small weights.
        return 4 * b_blk * C * HW128 * esize + w_bytes

    use_two_phase = force_two_phase or fused_footprint(1) > vmem_budget_bytes

    x2 = x.reshape(N, C, HW)

    if not use_two_phase:
        # Pack as many images per grid step as divide N and fit the budget.
        b_blk = 1
        for b in range(min(N, 8), 0, -1):
            if N % b == 0 and fused_footprint(b) <= vmem_budget_bytes:
                b_blk = b
                break
        if HW128 != HW:
            x2 = jnp.pad(x2, ((0, 0), (0, 0), (0, HW128 - HW)))
        vmem_limit = int(min(vmem_cap,
                             max(fused_footprint(b_blk) + (8 << 20), 32 << 20)))

        out = pl.pallas_call(
            functools.partial(_ca_fused_kernel, inv_hw=1.0 / HW),
            out_shape=jax.ShapeDtypeStruct((N, C, HW128), dtype),
            grid_spec=pltpu.PrefetchScalarGridSpec(
                num_scalar_prefetch=0,
                grid=(N // b_blk,),
                in_specs=[
                    pl.BlockSpec((b_blk, C, HW128), lambda n: (n, 0, 0)),  # x
                    pl.BlockSpec((C, Cr), lambda n: (0, 0)),   # conv1 w^T
                    pl.BlockSpec((1, Cr), lambda n: (0, 0)),   # conv1 b
                    pl.BlockSpec((Cr, C), lambda n: (0, 0)),   # conv2 w^T
                    pl.BlockSpec((1, C), lambda n: (0, 0)),    # conv2 b
                ],
                out_specs=pl.BlockSpec((b_blk, C, HW128), lambda n: (n, 0, 0)),
            ),
            compiler_params=pltpu.CompilerParams(
                dimension_semantics=("parallel",),
                vmem_limit_bytes=vmem_limit),
        )(x2, w1_t, b1_r, w2_t, b2_r)

        if HW128 != HW:
            out = out[:, :, :HW]
        return out.reshape(N, C, H, W)

    # ---- two-phase fallback: feature map does not fit VMEM in one block ----
    # Phase-2 per-step footprint ~ 4 * C * T * esize (x + out, double-buffered).
    t_elems = max(128, (vmem_budget_bytes // (4 * C * esize)) // 128 * 128)
    T = min(_round_up(HW, 128), t_elems)
    HW_T = _round_up(HW, T)
    n_t = HW_T // T
    if HW_T != HW:
        x2 = jnp.pad(x2, ((0, 0), (0, 0), (0, HW_T - HW)))
    vmem_limit = int(min(vmem_cap, max(4 * C * T * esize + (8 << 20), 32 << 20)))

    # Phase 1: per-channel sums over HW tiles (accumulator output).
    sums = pl.pallas_call(
        _pool_kernel,
        out_shape=jax.ShapeDtypeStruct((N, C, 1), jnp.float32),
        grid_spec=pltpu.PrefetchScalarGridSpec(
            num_scalar_prefetch=0,
            grid=(N, n_t),
            in_specs=[pl.BlockSpec((1, C, T), lambda n, t: (n, 0, t))],
            out_specs=pl.BlockSpec((1, C, 1), lambda n, t: (n, 0, 0)),
        ),
        compiler_params=pltpu.CompilerParams(
            dimension_semantics=("parallel", "arbitrary"),
            vmem_limit_bytes=vmem_limit),
    )(x2)

    # Tiny gate math on (N, C): cheaper as plain JAX than a dedicated kernel.
    means = sums[:, :, 0] * (1.0 / HW)                               # (N, C)
    y1 = jnp.maximum(means @ w1_t + b1_r, 0.0)                       # (N, Cr)
    gates = jax.nn.sigmoid(y1 @ w2_t + b2_r)[:, :, None]             # (N, C, 1)

    # Phase 2: broadcast multiply, HW tiled (both axes parallel -> megacore).
    out = pl.pallas_call(
        _scale_kernel,
        out_shape=jax.ShapeDtypeStruct((N, C, HW_T), dtype),
        grid_spec=pltpu.PrefetchScalarGridSpec(
            num_scalar_prefetch=0,
            grid=(N, n_t),
            in_specs=[pl.BlockSpec((1, C, T), lambda n, t: (n, 0, t)),
                      pl.BlockSpec((1, C, 1), lambda n, t: (n, 0, 0))],
            out_specs=pl.BlockSpec((1, C, T), lambda n, t: (n, 0, t)),
        ),
        compiler_params=pltpu.CompilerParams(
            dimension_semantics=("parallel", "parallel"),
            vmem_limit_bytes=vmem_limit),
    )(x2, gates)

    if HW_T != HW:
        out = out[:, :, :HW]
    return out.reshape(N, C, H, W)


def ca_layer_ref(x, w1, b1, w2, b2):
    """Pure-JAX reference matching the PyTorch forward."""
    y = jnp.mean(x, axis=(2, 3), keepdims=True)                      # (N, C, 1, 1)
    y = jnp.einsum('rc,nchw->nrhw', w1, y) + b1[None, :, None, None]
    y = jnp.maximum(y, 0.0)
    y = jnp.einsum('cr,nrhw->nchw', w2, y) + b2[None, :, None, None]
    y = jax.nn.sigmoid(y)
    return x * y


if __name__ == "__main__":
    key = jax.random.PRNGKey(0)
    kx, kw1, kb1, kw2, kb2, kx2 = jax.random.split(key, 6)

    N, C, H, W = 2, 32, 16, 16
    reduction = 4
    Cr = C // reduction

    x = jax.random.normal(kx, (N, C, H, W), dtype=jnp.float32)
    # Deterministic synthetic parameters (Conv2d 1x1 weights squeezed to 2D).
    w1 = jax.random.normal(kw1, (Cr, C), dtype=jnp.float32) * 0.1
    b1 = jax.random.normal(kb1, (Cr,), dtype=jnp.float32) * 0.1
    w2 = jax.random.normal(kw2, (C, Cr), dtype=jnp.float32) * 0.1
    b2 = jax.random.normal(kb2, (C,), dtype=jnp.float32) * 0.1

    ref = ca_layer_ref(x, w1, b1, w2, b2)

    # 1) fused single-pass path (default).
    out = jax.block_until_ready(ca_layer(x, w1, b1, w2, b2))
    assert out.shape == (N, C, H, W)
    assert jnp.allclose(out, ref, atol=1e-5, rtol=1e-5), "fused path mismatch"

    # 2) two-phase fallback, forced with a tiny budget so HW splits into
    #    multiple accumulation tiles (exercises pl.when init + accumulate).
    out2 = jax.block_until_ready(
        ca_layer(x, w1, b1, w2, b2, force_two_phase=True,
                 vmem_budget_bytes=70_000))
    assert jnp.allclose(out2, ref, atol=1e-5, rtol=1e-5), "two-phase mismatch"

    # 3) non-128-aligned spatial size (exercises the lane-padding path).
    Ho, Wo = 15, 15
    xo = jax.random.normal(kx2, (N, C, Ho, Wo), dtype=jnp.float32)
    refo = ca_layer_ref(xo, w1, b1, w2, b2)
    outo = jax.block_until_ready(ca_layer(xo, w1, b1, w2, b2))
    assert jnp.allclose(outo, refo, atol=1e-5, rtol=1e-5), "padded path mismatch"

    print("KERNEL_OK")
</pallas_src>

<mosaic_0001>
module attributes {stable_mosaic.version = 11 : i64} {
  func.func @_ca_fused_kernel(%arg0: i32, %arg1: memref<2x32x256xf32, #tpu.memory_space<vmem>>, %arg2: memref<32x8xf32, #tpu.memory_space<vmem>>, %arg3: memref<1x8xf32, #tpu.memory_space<vmem>>, %arg4: memref<8x32xf32, #tpu.memory_space<vmem>>, %arg5: memref<1x32xf32, #tpu.memory_space<vmem>>, %arg6: memref<2x32x256xf32, #tpu.memory_space<vmem>>) attributes {dimension_semantics = [#tpu.dimension_semantics<parallel>], iteration_bounds = array<i64: 1>, scalar_prefetch = 0 : i64, scratch_operands = 0 : i64, tpu.core_type = #tpu.core_type<tc>, window_params = [{transform_indices = @transform_0, window_bounds = array<i64: 2, 32, 256>}, {pipeline_mode = #tpu.pipeline_mode<synchronous>, transform_indices = @transform_1, window_bounds = array<i64: 32, 8>}, {pipeline_mode = #tpu.pipeline_mode<synchronous>, transform_indices = @transform_2, window_bounds = array<i64: 1, 8>}, {pipeline_mode = #tpu.pipeline_mode<synchronous>, transform_indices = @transform_3, window_bounds = array<i64: 8, 32>}, {pipeline_mode = #tpu.pipeline_mode<synchronous>, transform_indices = @transform_4, window_bounds = array<i64: 1, 32>}, {transform_indices = @transform_5, window_bounds = array<i64: 2, 32, 256>}]} {
    %c0 = arith.constant 0 : index
    %c0_0 = arith.constant 0 : index
    %c0_1 = arith.constant 0 : index
    %0 = vector.load %arg1[%c0, %c0_0, %c0_1] : memref<2x32x256xf32, #tpu.memory_space<vmem>>, vector<2x32x256xf32>
    %cst = arith.constant dense<0.000000e+00> : vector<2x32xf32>
    %1 = vector.multi_reduction <add>, %0, %cst [2] : vector<2x32x256xf32> to vector<2x32xf32>
    %cst_2 = arith.constant 3.906250e-03 : f32
    %2 = vector.broadcast %cst_2 : f32 to vector<2x32xf32>
    %3 = arith.mulf %1, %2 : vector<2x32xf32>
    %c0_3 = arith.constant 0 : index
    %c0_4 = arith.constant 0 : index
    %4 = vector.load %arg2[%c0_3, %c0_4] : memref<32x8xf32, #tpu.memory_space<vmem>>, vector<32x8xf32>
    %cst_5 = arith.constant dense<0.000000e+00> : vector<2x8xf32>
    %5 = tpu.matmul %3, %4, %cst_5 {dimension_numbers = #tpu.dot_dimension_numbers<[1], [0], [0], [1], [0, 0, 1, 1], [], []>} : vector<2x32xf32>, vector<32x8xf32>, vector<2x8xf32> -> vector<2x8xf32>
    %c0_6 = arith.constant 0 : index
    %c0_7 = arith.constant 0 : index
    %6 = vector.load %arg3[%c0_6, %c0_7] : memref<1x8xf32, #tpu.memory_space<vmem>>, vector<1x8xf32>
    %7 = vector.broadcast %6 : vector<1x8xf32> to vector<2x8xf32>
    %8 = arith.addf %5, %7 : vector<2x8xf32>
    %cst_8 = arith.constant 0.000000e+00 : f32
    %9 = vector.broadcast %cst_8 : f32 to vector<2x8xf32>
    %10 = arith.maximumf %8, %9 : vector<2x8xf32>
    %c0_9 = arith.constant 0 : index
    %c0_10 = arith.constant 0 : index
    %11 = vector.load %arg4[%c0_9, %c0_10] : memref<8x32xf32, #tpu.memory_space<vmem>>, vector<8x32xf32>
    %cst_11 = arith.constant dense<0.000000e+00> : vector<2x32xf32>
    %12 = tpu.matmul %10, %11, %cst_11 {dimension_numbers = #tpu.dot_dimension_numbers<[1], [0], [0], [1], [0, 0, 1, 1], [], []>} : vector<2x8xf32>, vector<8x32xf32>, vector<2x32xf32> -> vector<2x32xf32>
    %c0_12 = arith.constant 0 : index
    %c0_13 = arith.constant 0 : index
    %13 = vector.load %arg5[%c0_12, %c0_13] : memref<1x32xf32, #tpu.memory_space<vmem>>, vector<1x32xf32>
    %14 = vector.broadcast %13 : vector<1x32xf32> to vector<2x32xf32>
    %15 = arith.addf %12, %14 : vector<2x32xf32>
    %16 = arith.negf %15 : vector<2x32xf32>
    %17 = math.exp %16 : vector<2x32xf32>
    %cst_14 = arith.constant 1.000000e+00 : f32
    %18 = vector.broadcast %cst_14 : f32 to vector<2x32xf32>
    %19 = arith.addf %18, %17 : vector<2x32xf32>
    %20 = arith.divf %18, %19 : vector<2x32xf32>
    %21 = vector.shape_cast %20 : vector<2x32xf32> to vector<2x32x1xf32>
    %22 = vector.broadcast %21 : vector<2x32x1xf32> to vector<2x32x256xf32>
    %23 = arith.mulf %0, %22 : vector<2x32x256xf32>
    %c0_15 = arith.constant 0 : index
    %c0_16 = arith.constant 0 : index
    %c0_17 = arith.constant 0 : index
    %24 = vector.load %arg6[%c0_15, %c0_16, %c0_17] : memref<2x32x256xf32, #tpu.memory_space<vmem>>, vector<2x32x256xf32>
    tpu.vector_store %arg6[%c0_15, %c0_16, %c0_17], %23 {strides = array<i32>} : memref<2x32x256xf32, #tpu.memory_space<vmem>>, vector<2x32x256xf32>,
    return
  }
  func.func @transform_0(%arg0: i32) -> (i32, i32, i32) {
    %c0_i32 = arith.constant 0 : i32
    %c0_i32_0 = arith.constant 0 : i32
    %c0_i32_1 = arith.constant 0 : i32
    return %arg0, %c0_i32, %c0_i32_0 : i32, i32, i32
  }
  func.func @transform_1(%arg0: i32) -> (i32, i32) {
    %c0_i32 = arith.constant 0 : i32
    %c0_i32_0 = arith.constant 0 : i32
    %c0_i32_1 = arith.constant 0 : i32
    return %c0_i32, %c0_i32_0 : i32, i32
  }
  func.func @transform_2(%arg0: i32) -> (i32, i32) {
    %c0_i32 = arith.constant 0 : i32
    %c0_i32_0 = arith.constant 0 : i32
    %c0_i32_1 = arith.constant 0 : i32
    return %c0_i32, %c0_i32_0 : i32, i32
  }
  func.func @transform_3(%arg0: i32) -> (i32, i32) {
    %c0_i32 = arith.constant 0 : i32
    %c0_i32_0 = arith.constant 0 : i32
    %c0_i32_1 = arith.constant 0 : i32
    return %c0_i32, %c0_i32_0 : i32, i32
  }
  func.func @transform_4(%arg0: i32) -> (i32, i32) {
    %c0_i32 = arith.constant 0 : i32
    %c0_i32_0 = arith.constant 0 : i32
    %c0_i32_1 = arith.constant 0 : i32
    return %c0_i32, %c0_i32_0 : i32, i32
  }
  func.func @transform_5(%arg0: i32) -> (i32, i32, i32) {
    %c0_i32 = arith.constant 0 : i32
    %c0_i32_0 = arith.constant 0 : i32
    %c0_i32_1 = arith.constant 0 : i32
    return %arg0, %c0_i32, %c0_i32_0 : i32, i32, i32
  }
}

</mosaic_0001>

<bundles_post_ra>
// kernel: tpu_custom_call.1
= control target key start
LH: loop header
LB: loop body
LE: loop exit
PB: predicated region body
PF: predicated region fallthrough
CT: control target
= control target key end

     0   :  { %10 = vsyncpa [#allocation3], 0  ;;  %s622_s0 = inlined_call_operand.hbm [shape: f32[2,32,256], index: 0, kind: input, shape index: {}]   ;;  %s623_s1 = inlined_call_operand.vmem [shape: f32[32,8], index: 1, kind: input, shape index: {}]   ;;  %s624_s2 = inlined_call_operand.vmem [shape: f32[1,8], index: 2, kind: input, shape index: {}]   ;;  %s625_s3 = inlined_call_operand.vmem [shape: f32[8,32], index: 3, kind: input, shape index: {}]   ;;  %s626_s4 = inlined_call_operand.vmem [shape: f32[1,32], index: 4, kind: input, shape index: {}]   ;;  %s627_s5 = inlined_call_operand.hbm [shape: f32[2,32,256], index: 5, kind: output, shape index: {}]  }
   0x1   :  { %11 = vsyncpa [#allocation4], 0  ;;  %s481_s18 = smov [#allocation2]  }
   0x2   :  { %s17_s19 = sshll.u32 %s481_s18, 4  ;;  %s18_s19 = int_to_ptr.vmem [resolvable:$true] %s17_s19 }
   0x3   :  { %s445_s20 = scalar_lea.vmem %s18_s19, 2048  ;;  %p450_p1 = scmp.lt.s32.totalorder %s18_s19, %s18_s19 }
   0x4   :  { %p446_p0 = scmp.ne.s32.totalorder %s18_s19, %s445_s20  ;;  %p451_p2 = scmp.lt.s32.totalorder %s445_s20, %s445_s20 }
   0x6   :  { %p452_p3 = por %p451_p2, %p450_p1 }
   0x8   :  { %p453_p4 = pnand %p452_p3, %p446_p0 }
   0xa   :  { %456 = shalt.err (!%p453_p4)
}
   0xb   :  { %s482_s21 = smov 256   ;;  %s483_s22 = smov 16  }
   0xc   :  { %23 = dma.hbm_to_vmem [thread:$0]  %s622_s0, 2048, %s18_s19, [#allocation3], %s482_s21, %s482_s21, %s483_s22  }
   0xd   :  { %477 = dma.done.wait [#allocation3], 2048  }
   0xe   :  { %478 = vsyncadd [#allocation3], 4294965248  ;;  %v523_v0 = vld [vmem:[#allocation2 + $0x40] sm:$0xff]  ;;  %v525_v1 = vld [vmem:[#allocation2 + $0x48] sm:$0xff]  ;;  %v484_v24 = vmov 0.0   ;;  %vm485_vm0 = vmmov 0   ;;  %v102_v29 = vlaneseq }
   0xf   :  { %v527_v2 = vld [vmem:[#allocation2] sm:$0xff]  ;;  %v63_v3 = vadd.f32 %v525_v1, %v523_v0  ;;  %v531_v4 = vld [vmem:[#allocation2 + $0x8] sm:$0xff]  ;;  %v533_v5 = vld [vmem:[#allocation2 + $0x50] sm:$0xff]  ;;  %411 = vmatprep.subr.mxu0 %v484_v24  ;;  %422 = vmatprep.subr.mxu1 %v484_v24  ;;  %vm113_vm1 = vcmask 130112   ;;  %vm120_vm2 = vcmask 195712   ;;  %vm127_vm3 = vcmask 261312  }
  0x10   :  { %v535_v6 = vld [vmem:[#allocation2 + $0x58] sm:$0xff]  ;;  %v51_v7 = vadd.f32 %v531_v4, %v527_v2  ;;  %v539_v8 = vld [vmem:[#allocation2 + $0x10] sm:$0xff]  ;;  %v547_v12 = vld [vmem:[#allocation2 + $0x60] sm:$0xff]  ;;  %419 = vmatprep.mubr.msk.f32.mxu0 %vm485_vm0, %v484_v24  ;;  %424 = vmatprep.mubr.msk.f32.mxu1 %vm485_vm0, %v484_v24  ;;  %v103_v31 = vand.u32 127, %v102_v29  ;;  %v583_v36 = vshrl.u32 %v102_v29, 7  ;;  %vm148_vm4 = vcmask 1041409  }
  0x11   :  { %v541_v9 = vld [vmem:[#allocation2 + $0x18] sm:$0xff]  ;;  %64 = vadd.xlane.f32.xlu1 %v63_v3  ;;  %v66_v10 = vadd.f32 %v535_v6, %v533_v5  ;;  %v549_v13 = vld [vmem:[#allocation2 + $0x68] sm:$0xff]  ;;  %v551_v14 = vld [vmem:[#allocation2 + $0x20] sm:$0xff]  ;;  %vm150_vm5 = vcmask 261120   ;;  %vm232_vm6 = vcmask 64512  }
  0x12   :  { %52 = vadd.xlane.f32.xlu0 %v51_v7  ;;  %v54_v11 = vadd.f32 %v541_v9, %v539_v8  ;;  %v553_v15 = vld [vmem:[#allocation2 + $0x28] sm:$0xff]  ;;  %v69_v16 = vadd.f32 %v549_v13, %v547_v12  ;;  %v559_v18 = vld [vmem:[#allocation2 + $0x70] sm:$0xff]  ;;  %v561_v19 = vld [vmem:[#allocation2 + $0x78] sm:$0xff]  ;;  %v108_v33 = vadd.s32 4294967288, %v103_v31  ;;  %v115_v35 = vadd.s32 4294967280, %v103_v31 }
  0x13   :  { %v57_v17 = vadd.f32 %v553_v15, %v551_v14  ;;  %v563_v20 = vld [vmem:[#allocation2 + $0x30] sm:$0xff]  ;;  %v565_v21 = vld [vmem:[#allocation2 + $0x38] sm:$0xff]  ;;  %v72_v22 = vadd.f32 %v561_v19, %v559_v18  ;;  %v84_v27 = vld [vmem:[%s623_s1 + $0x8] sm:$0xff]  ;;  %v122_v40 = vadd.s32 4294967272, %v103_v31  ;;  %v106_v44 = vsub.s32 %v103_v31, %v583_v36 }
  0x14   :  { %v60_v23 = vadd.f32 %v565_v21, %v563_v20  ;;  %v86_v25 = vld [vmem:[%s623_s1 + $0x18] sm:$0xff]  ;;  %v85_v26 = vld [vmem:[%s623_s1 + $0x10] sm:$0xff]  ;;  %v83_v28 = vld [vmem:[%s623_s1] sm:$0xff]  ;;  %v111_v38 = vsub.s32 %v108_v33, %v583_v36  ;;  %v118_v42 = vsub.s32 %v115_v35, %v583_v36  ;;  %v314_v35 = vsub.s32 0, %v583_v36 }
  0x15   :  { %67 = vadd.xlane.f32.xlu1 %v66_v10  ;;  %412 = vmatpush3.msra.mxu0 %v86_v25  ;;  %v125_v51 = vsub.s32 %v122_v40, %v583_v36 }
  0x16   :  { %55 = vadd.xlane.f32.xlu0 %v54_v11  ;;  %413 = vmatprep.subr.mxu0 %v484_v24 }
  0x17   :  { %414 = vmatpush3.msra.mxu0 %v85_v26 }
  0x18   :  { %415 = vmatprep.subr.mxu0 %v484_v24 }
  0x19   :  { %70 = vadd.xlane.f32.xlu1 %v69_v16  ;;  %416 = vmatpush3.msra.mxu0 %v84_v27 }
  0x1a   :  { %58 = vadd.xlane.f32.xlu0 %v57_v17  ;;  %417 = vmatprep.subr.mxu0 %v484_v24 }
  0x1b   :  { %418 = vmatpush3.msra.mxu0 %v83_v28  ;;  %v401_v28 = vld [vmem:[%s626_s4] ss:$0 sm:$0xff] }
  0x1d   :  { %73 = vadd.xlane.f32.xlu1 %v72_v22  ;;  %v224_v22 = vld [vmem:[%s625_s3] sm:$0xff] }
  0x1e   :  { %61 = vadd.xlane.f32.xlu0 %v60_v23  ;;  %423 = vmatpush3.msra.mxu1 %v224_v22  ;;  %v399_v23 = vld [vmem:[%s624_s2] ss:$0 sm:$0xff]  ;;  %s486_s2 = smov [#allocation5]  }
  0x1f   :  { %s387_s3 = sshll.u32 %s486_s2, 4  ;;  %s388_s3 = int_to_ptr.vmem [resolvable:$true] %s387_s3 }
  0x20   :  { %s457_s4 = scalar_lea.vmem %s388_s3, 2048  ;;  %p462_p6 = scmp.lt.s32.totalorder %s388_s3, %s388_s3 }
  0x21   :  { %p458_p5 = scmp.ne.s32.totalorder %s388_s3, %s457_s4  ;;  %p463_p7 = scmp.lt.s32.totalorder %s457_s4, %s457_s4 }
  0x23   :  { %p464_p8 = por %p463_p7, %p462_p6 }
  0x25   :  { %p465_p9 = pnand %p464_p8, %p458_p5 }
  0x9a   :  { %v65_v30 = vpop.xlane.xlu1 %64 }
  0x9b   :  { %v53_v32 = vpop.xlane.xlu0 %52  ;;  %v79_v45 = vmul.f32 0.00390625, %v65_v30 }
  0x9c   :  { %v75_v48 = vmul.f32 0.00390625, %v53_v32 }
  0x9d   :  { %v132_v55 = vrot.slane %v79_v45, %v106_v44 }
  0x9e   :  { %v68_v34 = vpop.xlane.xlu1 %67  ;;  %v107_v59 = vrot.slane %v75_v48, %v106_v44 }
  0x9f   :  { %v56_v37 = vpop.xlane.xlu0 %55  ;;  %v80_v39 = vmul.f32 0.00390625, %v68_v34 }
  0xa0   :  { %v76_v41 = vmul.f32 0.00390625, %v56_v37 }
  0xa1   :  { %v136_v50 = vrot.slane %v80_v39, %v111_v38  ;;  %v333_v39 = vsub.s32 1, %v583_v36 }
  0xa2   :  { %v71_v43 = vpop.xlane.xlu1 %70  ;;  %v112_v52 = vrot.slane %v76_v41, %v111_v38 }
  0xa3   :  { %v81_v46 = vmul.f32 0.00390625, %v71_v43  ;;  %v59_v47 = vpop.xlane.xlu0 %58  ;;  %v137_v61 = vsel %vm113_vm1, %v136_v50, %v132_v55 }
  0xa4   :  { %v77_v49 = vmul.f32 0.00390625, %v59_v47  ;;  %v114_v63 = vsel %vm113_vm1, %v112_v52, %v107_v59 }
  0xa5   :  { %v141_v53 = vrot.slane %v81_v46, %v118_v42 }
  0xa6   :  { %v74_v54 = vpop.xlane.xlu1 %73  ;;  %v119_v56 = vrot.slane %v77_v49, %v118_v42 }
  0xa7   :  { %v82_v57 = vmul.f32 0.00390625, %v74_v54  ;;  %v62_v58 = vpop.xlane.xlu0 %61  ;;  %v142_v3 = vsel %vm120_vm2, %v141_v53, %v137_v61 }
  0xa8   :  { %v78_v60 = vmul.f32 0.00390625, %v62_v58  ;;  %v121_v10 = vsel %vm120_vm2, %v119_v56, %v114_v63 }
  0xa9   :  { %v146_v62 = vrot.slane %v82_v57, %v125_v51 }
  0xaa   :  { %v126_v7 = vrot.slane %v78_v60, %v125_v51 }
  0xab   :  { %v147_v11 = vsel %vm127_vm3, %v146_v62, %v142_v3 }
  0xac   :  { %v128_v16 = vsel %vm127_vm3, %v126_v7, %v121_v10 }
  0xad   :  { %v149_v17 = vsel %vm148_vm4, %v147_v11, %v128_v16 }
  0xae   :  { %420 = vmatmul.mubr.msk.f32.vlgmr.msra.gmra.mxu0 %vm150_vm5, %v149_v17 }
 0x16e   :  { %v219_v24 = vpop.f32.mrf.mxu0 }
 0x16f   :  { %v220_v25 = vadd.f32 %v399_v23, %v219_v24 }
 0x170   :  { %v421_v26 = vpop.f32.mrf.mxu0 }
 0x171   :  { %v223_v27 = vmax.f32 %v220_v25, 0.0 }
 0x173   :  { %425 = vmatmul.mubr.msk.f32.vlgmr.msra.gmra.mxu1 %vm232_vm6, %v223_v27 }
 0x233   :  { %v302_v29 = vpop.f32.mrf.mxu1 }
 0x234   :  { %v303_v30 = vadd.f32 %v401_v28, %v302_v29 }
 0x235   :  { %v426_v31 = vpop.f32.mrf.mxu1 }
 0x236   :  { %v403_v32 = vmul.f32 -1.442695, %v303_v30 }
 0x238   :  { %433 = vpow2.f32 %v403_v32 }
 0x245   :  { %v434_v33 = vpop.eup %433 }
 0x246   :  { %v309_v34 = vadd.f32 1.0, %v434_v33 }
 0x248   :  { %435 = vrcp.f32 %v309_v34 }
 0x255   :  { %v436_v37 = vpop.eup %435 }
 0x256   :  { %v315_v38 = vrot.slane %v436_v37, %v314_v35  ;;  %v334_v40 = vrot.slane %v436_v37, %v333_v39 }
 0x258   :  { %321 = vbcast.lane.b32.xlu1 %v315_v38, 264  ;;  %317 = vbcast.lane.b32.xlu0 %v315_v38, 256 }
 0x25c   :  { %325 = vbcast.lane.b32.xlu1 %v315_v38, 272  ;;  %336 = vbcast.lane.b32.xlu0 %v334_v40, 256 }
 0x260   :  { %329 = vbcast.lane.b32.xlu1 %v315_v38, 280  ;;  %344 = vbcast.lane.b32.xlu0 %v334_v40, 272 }
 0x264   :  { %340 = vbcast.lane.b32.xlu1 %v334_v40, 264 }
 0x268   :  { %348 = vbcast.lane.b32.xlu1 %v334_v40, 280 }
 0x2ca   :  { %v322_v41 = vpop.permute.xlu1 %321  ;;  %v318_v42 = vpop.permute.xlu0 %317 }
 0x2cb   :  { %v352_v43 = vmul.f32 %v322_v41, %v539_v8  ;;  %v353_v44 = vmul.f32 %v322_v41, %v541_v9  ;;  %v350_v45 = vmul.f32 %v318_v42, %v527_v2  ;;  %v351_v46 = vmul.f32 %v318_v42, %v531_v4 }
 0x2cd   :  { %368 = vst [vmem:[#allocation5 + $0x10] sm:$0xff] %v352_v43  ;;  %369 = vst [vmem:[#allocation5 + $0x18] sm:$0xff] %v353_v44 }
 0x2ce   :  { %366 = vst [vmem:[#allocation5] sm:$0xff] %v350_v45  ;;  %367 = vst [vmem:[#allocation5 + $0x8] sm:$0xff] %v351_v46  ;;  %v326_v36 = vpop.permute.xlu1 %325  ;;  %v337_v47 = vpop.permute.xlu0 %336 }
 0x2cf   :  { %v354_v48 = vmul.f32 %v326_v36, %v551_v14  ;;  %v355_v49 = vmul.f32 %v326_v36, %v553_v15  ;;  %v358_v50 = vmul.f32 %v337_v47, %v523_v0  ;;  %v359_v8 = vmul.f32 %v337_v47, %v525_v1 }
 0x2d1   :  { %370 = vst [vmem:[#allocation5 + $0x20] sm:$0xff] %v354_v48  ;;  %371 = vst [vmem:[#allocation5 + $0x28] sm:$0xff] %v355_v49 }
 0x2d2   :  { %374 = vst [vmem:[#allocation5 + $0x40] sm:$0xff] %v358_v50  ;;  %375 = vst [vmem:[#allocation5 + $0x48] sm:$0xff] %v359_v8  ;;  %v330_v2 = vpop.permute.xlu1 %329  ;;  %v345_v4 = vpop.permute.xlu0 %344 }
 0x2d3   :  { %v356_v9 = vmul.f32 %v330_v2, %v563_v20  ;;  %v357_v51 = vmul.f32 %v330_v2, %v565_v21  ;;  %v362_v52 = vmul.f32 %v345_v4, %v547_v12  ;;  %v363_v14 = vmul.f32 %v345_v4, %v549_v13 }
 0x2d5   :  { %372 = vst [vmem:[#allocation5 + $0x30] sm:$0xff] %v356_v9  ;;  %373 = vst [vmem:[#allocation5 + $0x38] sm:$0xff] %v357_v51 }
 0x2d6   :  { %378 = vst [vmem:[#allocation5 + $0x60] sm:$0xff] %v362_v52  ;;  %379 = vst [vmem:[#allocation5 + $0x68] sm:$0xff] %v363_v14  ;;  %v341_v0 = vpop.permute.xlu1 %340 }
 0x2d7   :  { %v360_v1 = vmul.f32 %v341_v0, %v533_v5  ;;  %v361_v15 = vmul.f32 %v341_v0, %v535_v6 }
 0x2d9   :  { %376 = vst [vmem:[#allocation5 + $0x50] sm:$0xff] %v360_v1  ;;  %377 = vst [vmem:[#allocation5 + $0x58] sm:$0xff] %v361_v15 }
 0x2da   :  { %v349_v20 = vpop.permute.xlu1 %348 }
 0x2db   :  { %v364_v21 = vmul.f32 %v349_v20, %v559_v18  ;;  %v365_v12 = vmul.f32 %v349_v20, %v561_v19 }
 0x2dd   :  { %380 = vst [vmem:[#allocation5 + $0x70] sm:$0xff] %v364_v21  ;;  %381 = vst [vmem:[#allocation5 + $0x78] sm:$0xff] %v365_v12 }
 0x2de   :  { %468 = shalt.err (!%p465_p9)
}
 0x2df   :  { %393 = dma.vmem_to_hbm [thread:$0]  %s388_s3, 2048, %s627_s5, [#allocation4], %s482_s21, %s482_s21, %s483_s22  }
 0x2e0   :  { %479 = dma.done.wait [#allocation4], 2048  }
 0x2e1   :  { %480 = vsyncadd [#allocation4], 4294965248 }
 0x2e2   :  { %397 = vsyncpa [#allocation3], 1 }
 0x2e3   :  { %398 = vsyncpa [#allocation4], 1 }

</bundles_post_ra>
